<compile_context>
chip_gen: v7x
topology: tpu7x:2x2x1
jax: 0.10.0
libtpu: 0.0.40
codegen_flags: <defaults>
</compile_context>

<pallas_src>
import functools

import jax
import jax.numpy as jnp
from jax.experimental import pallas as pl
from jax.experimental.pallas import tpu as pltpu


def _running_norm_kernel(n_ref, x_ref, mean_ref, std_ref, o_ref, *,
                         demean, destd, clip):
    # n lives in SMEM (scalar prefetch); gate the whole tile on it.
    @pl.when(n_ref[0] > 0)
    def _normalize():
        y = x_ref[...].astype(jnp.float32)      # (tile_rows, Dlane)
        if demean:
            y = y - mean_ref[...]               # broadcast (1, Dlane)
        if destd:
            # Exact reciprocal on the (1, Dlane) stats row, then a single
            # vmul per element (amortizes the divide over tile_rows rows).
            inv = 1.0 / (std_ref[...] + 1e-08)
            y = y * inv
        if clip:  # truthiness on purpose: matches PyTorch `if self.clip:`
            y = jnp.clip(y, -clip, clip)
        o_ref[...] = y.astype(o_ref.dtype)

    @pl.when(n_ref[0] <= 0)
    def _passthrough():
        o_ref[...] = x_ref[...]


def _round_up(a, b):
    return -(-a // b) * b


def running_norm_forward(x, n, mean, std, *, demean=True, destd=True,
                         clip=5.0, tile_rows=None):
    """x: (B, D); n: scalar int; mean/std: (D,).  Returns normalized x."""
    B, D = x.shape
    dtype = x.dtype
    mean = jnp.asarray(mean, jnp.float32).reshape(D)
    std = jnp.asarray(std, jnp.float32).reshape(D)
    n_arr = jnp.asarray(n, dtype=jnp.int32).reshape(1)

    # ---- lane-dense packing: make the last dim a multiple of 128 if possible.
    pack = 128 // D if (D < 128 and 128 % D == 0) else 1
    if pack > 1:
        pad_b = (-B) % pack
        if pad_b:
            x = jnp.pad(x, ((0, pad_b), (0, 0)))     # <= pack-1 rows of pad
        rows = (B + pad_b) // pack
        dlane = pack * D
        x_flat = x.reshape(rows, dlane)
        mean_row = jnp.tile(mean, pack).reshape(1, dlane)
        std_row = jnp.tile(std, pack).reshape(1, dlane)
    else:
        rows, dlane = B, D
        x_flat = x
        mean_row = mean.reshape(1, D)
        std_row = std.reshape(1, D)

    # Sublane granularity for the tiled (multi-step) case, per dtype packing.
    itemsize = int(jnp.dtype(dtype).itemsize)
    sub = max(8, 32 // max(itemsize, 1))

    # ---- per-generation tile sizing from physical VMEM capacity.
    try:
        vmem_cap = int(pltpu.get_tpu_info().vmem_capacity_bytes)
    except Exception:
        vmem_cap = 64 * 1024 * 1024  # conservative (v7x-sized) fallback
    row_bytes = max(dlane * itemsize, 1)
    if tile_rows is None:
        # x + out, each double-buffered -> 4 live tiles; use <= 1/4 of VMEM.
        budget = vmem_cap // 4
        tile_rows = budget // (4 * row_bytes)
        tile_rows = max(sub, min(4096, (tile_rows // sub) * sub))
        # Keep at least 2 grid steps when there is real work (pipeline overlap
        # + v7x has 2 TensorCores that split a "parallel" grid axis).
        if rows >= 2 * sub:
            half = max(sub, _round_up((rows + 1) // 2, sub))
            tile_rows = min(tile_rows, half)
    tile_rows = max(sub, (tile_rows // sub) * sub)

    if tile_rows >= rows:
        # Single grid step: block == full array dims (always a legal block,
        # no alignment / padding requirement).
        tile_rows = rows
        grid = (1,)
    else:
        # Non-divisible grids are fine: the last block is boundary-masked.
        grid = (pl.cdiv(rows, tile_rows),)

    # Explicit scoped-VMEM budget: 4 live tiles + stats rows + headroom.
    tile_bytes = tile_rows * row_bytes
    vmem_limit = int(min(vmem_cap, 4 * tile_bytes + 8 * dlane * 4 + (4 << 20)))
    vmem_limit = max(vmem_limit, 8 << 20)

    kernel = functools.partial(_running_norm_kernel,
                               demean=demean, destd=destd, clip=clip)

    grid_spec = pltpu.PrefetchScalarGridSpec(
        num_scalar_prefetch=1,                      # n lands in SMEM
        grid=grid,
        in_specs=[
            pl.BlockSpec((tile_rows, dlane), lambda i, n_ref: (i, 0)),  # x
            pl.BlockSpec((1, dlane), lambda i, n_ref: (0, 0)),          # mean
            pl.BlockSpec((1, dlane), lambda i, n_ref: (0, 0)),          # std
        ],
        out_specs=pl.BlockSpec((tile_rows, dlane), lambda i, n_ref: (i, 0)),
    )

    out_flat = pl.pallas_call(
        kernel,
        out_shape=jax.ShapeDtypeStruct((rows, dlane), dtype),
        grid_spec=grid_spec,
        compiler_params=pltpu.CompilerParams(
            dimension_semantics=("parallel",),
            vmem_limit_bytes=vmem_limit),
    )(n_arr, x_flat, mean_row, std_row)

    # Undo lane packing (drops the <= pack-1 padded rows).
    if pack > 1:
        out = out_flat.reshape(-1, D)[:B]
    else:
        out = out_flat
    return out


if __name__ == "__main__":
    key = jax.random.PRNGKey(0)
    kx, km, ks = jax.random.split(key, 3)

    B, D = 16, 32                       # small shapes: batch=16, dim=32
    x = jax.random.normal(kx, (B, D), dtype=jnp.float32) * 3.0

    # Deterministic synthetic running statistics (as if update() had run).
    mean = jax.random.normal(km, (D,), dtype=jnp.float32) * 0.5
    std = jax.random.uniform(ks, (D,), dtype=jnp.float32,
                             minval=0.5, maxval=2.0)
    n = jnp.int32(10)                   # n > 0 -> normalization active

    out = running_norm_forward(x, n, mean, std, demean=True, destd=True,
                               clip=5.0)
    out = jax.block_until_ready(out)

    # Reference check in plain JAX (slightly relaxed tol: kernel uses
    # reciprocal-multiply instead of a divide).
    ref = jnp.clip((x - mean[None, :]) / (std[None, :] + 1e-08), -5.0, 5.0)
    assert jnp.allclose(out, ref, atol=1e-5, rtol=1e-5), "mismatch vs reference"

    # n == 0 pass-through path.
    out0 = jax.block_until_ready(
        running_norm_forward(x, jnp.int32(0), mean, std))
    assert jnp.allclose(out0, x), "n==0 should pass input through"

    # Odd batch size (exercises the pack-padding / partial-block path).
    x_odd = x[:13]
    out_odd = jax.block_until_ready(
        running_norm_forward(x_odd, n, mean, std))
    ref_odd = jnp.clip((x_odd - mean[None, :]) / (std[None, :] + 1e-08),
                       -5.0, 5.0)
    assert jnp.allclose(out_odd, ref_odd, atol=1e-5, rtol=1e-5), "odd-batch mismatch"

    # Larger batch with a non-divisible tile (exercises masked boundary block).
    B2 = 1000
    x_big = jax.random.normal(kx, (B2, D), dtype=jnp.float32)
    out_big = jax.block_until_ready(
        running_norm_forward(x_big, n, mean, std, tile_rows=64))
    ref_big = jnp.clip((x_big - mean[None, :]) / (std[None, :] + 1e-08),
                       -5.0, 5.0)
    assert jnp.allclose(out_big, ref_big, atol=1e-5, rtol=1e-5), "big-batch mismatch"

    print("KERNEL_OK")
</pallas_src>

<mosaic_0001>
module attributes {stable_mosaic.version = 11 : i64} {
  func.func @_running_norm_kernel(%arg0: i32, %arg1: memref<1xi32, #tpu.memory_space<smem>>, %arg2: memref<4x128xf32, #tpu.memory_space<vmem>>, %arg3: memref<1x128xf32, #tpu.memory_space<vmem>>, %arg4: memref<1x128xf32, #tpu.memory_space<vmem>>, %arg5: memref<4x128xf32, #tpu.memory_space<vmem>>) attributes {dimension_semantics = [#tpu.dimension_semantics<parallel>], iteration_bounds = array<i64: 1>, scalar_prefetch = 1 : i64, scratch_operands = 0 : i64, tpu.core_type = #tpu.core_type<tc>, window_params = [{transform_indices = @transform_0, window_bounds = array<i64: 4, 128>}, {pipeline_mode = #tpu.pipeline_mode<synchronous>, transform_indices = @transform_1, window_bounds = array<i64: 1, 128>}, {pipeline_mode = #tpu.pipeline_mode<synchronous>, transform_indices = @transform_2, window_bounds = array<i64: 1, 128>}, {transform_indices = @transform_3, window_bounds = array<i64: 4, 128>}]} {
    %c0 = arith.constant 0 : index
    %0 = memref.load %arg1[%c0] : memref<1xi32, #tpu.memory_space<smem>>
    %c0_i32 = arith.constant 0 : i32
    %1 = arith.cmpi sgt, %0, %c0_i32 : i32
    %2 = arith.extui %1 : i1 to i32
    %c0_i32_0 = arith.constant 0 : i32
    %3 = arith.cmpi ne, %2, %c0_i32_0 : i32
    scf.if %3 {
      %c0_4 = arith.constant 0 : index
      %c0_5 = arith.constant 0 : index
      %8 = vector.load %arg2[%c0_4, %c0_5] : memref<4x128xf32, #tpu.memory_space<vmem>>, vector<4x128xf32>
      %c0_6 = arith.constant 0 : index
      %c0_7 = arith.constant 0 : index
      %9 = vector.load %arg3[%c0_6, %c0_7] : memref<1x128xf32, #tpu.memory_space<vmem>>, vector<1x128xf32>
      %10 = vector.broadcast %9 : vector<1x128xf32> to vector<4x128xf32>
      %11 = arith.subf %8, %10 : vector<4x128xf32>
      %c0_8 = arith.constant 0 : index
      %c0_9 = arith.constant 0 : index
      %12 = vector.load %arg4[%c0_8, %c0_9] : memref<1x128xf32, #tpu.memory_space<vmem>>, vector<1x128xf32>
      %cst = arith.constant 9.99999993E-9 : f32
      %13 = vector.broadcast %cst : f32 to vector<1x128xf32>
      %14 = arith.addf %12, %13 : vector<1x128xf32>
      %cst_10 = arith.constant 1.000000e+00 : f32
      %15 = vector.broadcast %cst_10 : f32 to vector<1x128xf32>
      %16 = arith.divf %15, %14 : vector<1x128xf32>
      %17 = vector.broadcast %16 : vector<1x128xf32> to vector<4x128xf32>
      %18 = arith.mulf %11, %17 : vector<4x128xf32>
      %cst_11 = arith.constant -5.000000e+00 : f32
      %cst_12 = arith.constant 5.000000e+00 : f32
      %19 = vector.broadcast %cst_11 : f32 to vector<4x128xf32>
      %20 = arith.maximumf %19, %18 : vector<4x128xf32>
      %21 = vector.broadcast %cst_12 : f32 to vector<4x128xf32>
      %22 = arith.minimumf %21, %20 : vector<4x128xf32>
      %c0_13 = arith.constant 0 : index
      %c0_14 = arith.constant 0 : index
      %23 = vector.load %arg5[%c0_13, %c0_14] : memref<4x128xf32, #tpu.memory_space<vmem>>, vector<4x128xf32>
      tpu.vector_store %arg5[%c0_13, %c0_14], %22 {strides = array<i32>} : memref<4x128xf32, #tpu.memory_space<vmem>>, vector<4x128xf32>,
    } else {
    }
    %c0_1 = arith.constant 0 : index
    %4 = memref.load %arg1[%c0_1] : memref<1xi32, #tpu.memory_space<smem>>
    %c0_i32_2 = arith.constant 0 : i32
    %5 = arith.cmpi sle, %4, %c0_i32_2 : i32
    %6 = arith.extui %5 : i1 to i32
    %c0_i32_3 = arith.constant 0 : i32
    %7 = arith.cmpi ne, %6, %c0_i32_3 : i32
    scf.if %7 {
      %c0_4 = arith.constant 0 : index
      %c0_5 = arith.constant 0 : index
      %8 = vector.load %arg2[%c0_4, %c0_5] : memref<4x128xf32, #tpu.memory_space<vmem>>, vector<4x128xf32>
      %c0_6 = arith.constant 0 : index
      %c0_7 = arith.constant 0 : index
      %9 = vector.load %arg5[%c0_6, %c0_7] : memref<4x128xf32, #tpu.memory_space<vmem>>, vector<4x128xf32>
      tpu.vector_store %arg5[%c0_6, %c0_7], %8 {strides = array<i32>} : memref<4x128xf32, #tpu.memory_space<vmem>>, vector<4x128xf32>,
    } else {
    }
    return
  }
  func.func @transform_0(%arg0: i32, %arg1: memref<1xi32, #tpu.memory_space<smem>>) -> (i32, i32) {
    %c0_i32 = arith.constant 0 : i32
    %c0_i32_0 = arith.constant 0 : i32
    return %arg0, %c0_i32 : i32, i32
  }
  func.func @transform_1(%arg0: i32, %arg1: memref<1xi32, #tpu.memory_space<smem>>) -> (i32, i32) {
    %c0_i32 = arith.constant 0 : i32
    %c0_i32_0 = arith.constant 0 : i32
    %c0_i32_1 = arith.constant 0 : i32
    return %c0_i32, %c0_i32_0 : i32, i32
  }
  func.func @transform_2(%arg0: i32, %arg1: memref<1xi32, #tpu.memory_space<smem>>) -> (i32, i32) {
    %c0_i32 = arith.constant 0 : i32
    %c0_i32_0 = arith.constant 0 : i32
    %c0_i32_1 = arith.constant 0 : i32
    return %c0_i32, %c0_i32_0 : i32, i32
  }
  func.func @transform_3(%arg0: i32, %arg1: memref<1xi32, #tpu.memory_space<smem>>) -> (i32, i32) {
    %c0_i32 = arith.constant 0 : i32
    %c0_i32_0 = arith.constant 0 : i32
    return %arg0, %c0_i32 : i32, i32
  }
}

</mosaic_0001>

<bundles_post_ra>
// kernel: tpu_custom_call.1
= control target key start
LH: loop header
LB: loop body
LE: loop exit
PB: predicated region body
PF: predicated region fallthrough
CT: control target
= control target key end

     0   :  { %s195_s0 = inlined_call_operand.<no memory space> [shape: s32[1], index: 0, kind: input, shape index: {}]   ;;  %s196_s1 = inlined_call_operand.hbm [shape: f32[4,128], index: 1, kind: input, shape index: {}]   ;;  %s197_s2 = inlined_call_operand.vmem [shape: f32[1,128], index: 2, kind: input, shape index: {}]   ;;  %s198_s3 = inlined_call_operand.vmem [shape: f32[1,128], index: 3, kind: input, shape index: {}]   ;;  %s199_s4 = inlined_call_operand.hbm [shape: f32[4,128], index: 4, kind: output, shape index: {}]  }
   0x1   :  { %9 = sst [smem:[#allocation3]] %s195_s0 }
   0x2   :  { %10 = vsyncpa [#allocation5], 0 }
   0x3   :  { %11 = vsyncpa [#allocation6], 0  ;;  %s135_s17 = smov [#allocation4]   ;;  %s87_s21 = scalar_lea.hbm %s196_s1, 64 }
   0x4   :  { %s18_s18 = sshll.u32 %s135_s17, 4  ;;  %p88_p0 = scmp.ne.s32.totalorder %s196_s1, %s87_s21  ;;  %s19_s18 = int_to_ptr.vmem [resolvable:$true] %s18_s18 }
   0x5   :  { %p91_p1 = scmp.lt.u32.totalorder %s87_s21, %s196_s1 }
   0x7   :  { %p93_p2 = pnand %p91_p1, %p88_p0 }
   0x9   :  { %96 = shalt.err (!%p93_p2)
}
   0xa   :  { %s97_s0 = scalar_lea.vmem %s19_s18, 64  ;;  %p102_p4 = scmp.lt.s32.totalorder %s19_s18, %s19_s18 }
   0xb   :  { %p98_p3 = scmp.ne.s32.totalorder %s19_s18, %s97_s0  ;;  %p103_p5 = scmp.lt.s32.totalorder %s97_s0, %s97_s0 }
   0xd   :  { %p104_p6 = por %p103_p5, %p102_p4 }
   0xf   :  { %p105_p7 = pnand %p104_p6, %p98_p3 }
  0x11   :  { %108 = shalt.err (!%p105_p7)
}
  0x12   :  { %21 = dma.hbm_to_vmem [thread:$0]  %s196_s1, 64, %s19_s18, [#allocation5]  }
  0x13   :  { %131 = dma.done.wait [#allocation5], 64  }
  0x14   :  { %132 = vsyncadd [#allocation5], 4294967232  ;;  %s29_s28 = sld [smem:[#allocation3]] }
  0x1a   :  { %p79_p8 = scmp.le.s32.totalorder %s29_s28, 0 }
  0x1b   :  { %v43_v0 = vld [vmem:[%s198_s3] sm:$0x1] (!%p79_p8)  ;;  %v48_v2 = vlaneseq (!%p79_p8) }
  0x1c   :  { %33 = sbr.rel (%p79_p8) target bundleno = 48 (0x30), region = 21  ;;  %v44_v1 = vadd.f32 (!%p79_p8), 1e-08, %v43_v0  ;;  %v34_v4 = vld [vmem:[#allocation4] sm:$0xf] (!%p79_p8) }
  0x1d   :  { %v49_v3 = vshrl.u32 (!%p79_p8), %v48_v2, 7  ;;  %v80_v5 = vld [vmem:[%s197_s2] ss:$0 sm:$0xff] (!%p79_p8) }
  0x1e   :  { %85 = vrcp.f32 (!%p79_p8), %v44_v1  ;;  %v42_v7 = vsub.f32 (!%p79_p8), %v34_v4, %v80_v5 }
  0x1f   :  { %v50_v6 = vsub.s32 (!%p79_p8), 0, %v49_v3 }
  0x28   :  { %v86_v8 = vpop.eup %85 }
  0x29   :  { %v51_v9 = vrot.slane %v86_v8, %v50_v6 }
  0x2b   :  { %v53_v10 = vmul.f32 %v51_v9, %v42_v7 }
  0x2d   :  { %v81_v11 = vclamps-f32 %v53_v10, 5.0 }
  0x2f   :  { %56 = vst [vmem:[#allocation7] sm:$0xf] %v81_v11 }
  0x30 PF:  { %s57_s1 = sld [smem:[#allocation3]] }
  0x36   :  { %p82_p9 = scmp.gt.s32.totalorder %s57_s1, 0 }
  0x37   :  { %v62_v12 = vld [vmem:[#allocation4] sm:$0xf] (!%p82_p9) }
  0x38   :  { %61 = sbr.rel (%p82_p9) target bundleno = 63 (0x3f), region = 25  ;;  %63 = vst [vmem:[#allocation7] sm:$0xf] (!%p82_p9), %v62_v12 }
  0x3f PF:  { %s136_s3 = smov [#allocation7]  }
  0x40   :  { %s70_s7 = sshll.u32 %s136_s3, 4  ;;  %s71_s7 = int_to_ptr.vmem [resolvable:$true] %s70_s7 }
  0x41   :  { %s109_s8 = scalar_lea.vmem %s71_s7, 64  ;;  %p114_p11 = scmp.lt.s32.totalorder %s71_s7, %s71_s7 }
  0x42   :  { %p110_p10 = scmp.ne.s32.totalorder %s71_s7, %s109_s8  ;;  %p115_p12 = scmp.lt.s32.totalorder %s109_s8, %s109_s8 }
  0x44   :  { %p116_p13 = por %p115_p12, %p114_p11 }
  0x46   :  { %p117_p0 = pnand %p116_p13, %p110_p10 }
  0x48   :  { %120 = shalt.err (!%p117_p0)
}
  0x49   :  { %s121_s10 = scalar_lea.hbm %s199_s4, 64 }
  0x4a   :  { %p122_p1 = scmp.ne.s32.totalorder %s199_s4, %s121_s10  ;;  %p125_p2 = scmp.lt.u32.totalorder %s121_s10, %s199_s4 }
  0x4c   :  { %p127_p3 = pnand %p125_p2, %p122_p1 }
  0x4e   :  { %130 = shalt.err (!%p127_p3)
}
  0x4f   :  { %73 = dma.vmem_to_hbm [thread:$0]  %s71_s7, 64, %s199_s4, [#allocation6]  }
  0x50   :  { %133 = dma.done.wait [#allocation6], 64  }
  0x51   :  { %134 = vsyncadd [#allocation6], 4294967232 }
  0x52   :  { %77 = vsyncpa [#allocation5], 1 }
  0x53   :  { %78 = vsyncpa [#allocation6], 1 }

</bundles_post_ra>
